<compile_context>
chip_gen: v5e
topology: v5e:2x2
jax: 0.10.0
libtpu: 0.0.40
codegen_flags: <defaults>
</compile_context>

<pallas_src>
import jax
import jax.numpy as jnp
from jax.experimental import pallas as pl
from jax.experimental.pallas import tpu as pltpu


_LANES = 128
# Widest lane-dense slabs first (unmasked stores, fewer sublane groups/blk).
_COL_CANDIDATES = (32 * _LANES, 16 * _LANES, 8 * _LANES, 4 * _LANES,
                   2 * _LANES, _LANES)
_MAX_BLOCK_BYTES = 4 << 20      # per-block cap -> <=16 MiB live (2 bufs x in+out)
_VMEM_LIMIT_BYTES = 32 << 20    # safe on v5e/v6e (128 MiB) and v7x (64 MiB) phys
_MIN_GRID_STEPS = 2             # let v7x's 2 TensorCores both participate


def _passthrough_kernel(x_ref, o_ref):
    # Scaffold: the dispatcher adds no computation; real subclass compute
    # would replace this body (and would then justify the VMEM round trip).
    o_ref[...] = x_ref[...]


def _sublane_multiple(itemsize: int) -> int:
    """Native packing-tile row multiple: 8 (32-bit), 16 (16-bit), 32 (8-bit)."""
    return max(8, 32 // max(1, int(itemsize)))


def _exact_block_rows(rows: int, cols: int, itemsize: int, sub: int):
    """Block rows for an exact (no-pad) layout, or None if no clean tiling."""
    max_rows = max(sub, (_MAX_BLOCK_BYTES // (cols * itemsize)) // sub * sub)
    if rows <= max_rows:
        # Fits in one block.  Split into >= _MIN_GRID_STEPS blocks when the
        # row count allows so the 'parallel' axis can use both v7x TCs.
        if rows % sub == 0 and rows >= _MIN_GRID_STEPS * sub:
            r = (rows // _MIN_GRID_STEPS) // sub * sub
            while r >= sub:
                if rows % r == 0:
                    return r
                r -= sub
        return rows  # single full-extent block (legal even if rows % sub != 0)
    # Needs multiple blocks: largest multiple-of-sub divisor within budget.
    r = min(rows, max_rows)
    r -= r % sub
    while r >= sub:
        if rows % r == 0:
            return r
        r -= sub
    return None


def _plan_layout(total: int, itemsize: int):
    """Return (rows, cols, block_rows, pad_elems) for a lane-dense 2-D slab."""
    sub = _sublane_multiple(itemsize)

    # 1) Exact factorization (no padding), widest lanes first.
    for cols in _COL_CANDIDATES:
        if total % cols:
            continue
        br = _exact_block_rows(total // cols, cols, itemsize, sub)
        if br is not None:
            return total // cols, cols, br, 0

    # 2) Padded layout: pad the flattened array up to rows * cols.
    cols = next((c for c in _COL_CANDIDATES if c <= total), _LANES)
    rows = -(-total // cols)
    max_rows = max(sub, (_MAX_BLOCK_BYTES // (cols * itemsize)) // sub * sub)
    if rows <= sub:
        block_rows = rows                       # tiny: one full-extent block
        padded_rows = rows
    else:
        target = min(max_rows, max(sub, -(-rows // _MIN_GRID_STEPS)))
        block_rows = max(sub, target // sub * sub)
        padded_rows = -(-rows // block_rows) * block_rows
    return padded_rows, cols, block_rows, padded_rows * cols - total


def _pallas_passthrough(x: jax.Array, *, donate: bool = False) -> jax.Array:
    """Lane-dense Pallas pass-through scaffold (shape/dtype preserving).

    Not on the dispatch hot path; kept as the call site where real subclass
    compute would live.  `donate=True` only when the caller actually donates
    `x` (otherwise aliasing would trigger a defensive input copy).
    """
    total = int(x.size)
    if total == 0:
        return x
    itemsize = jnp.dtype(x.dtype).itemsize
    rows, cols, block_rows, pad = _plan_layout(total, itemsize)

    # NOTE: the flatten/pad below may materialize a copy outside the kernel;
    # acceptable for a scaffold, and unavoidable for non-128-divisible sizes.
    flat = x.reshape(-1)
    if pad:
        flat = jnp.pad(flat, (0, pad))
    x2 = flat.reshape(rows, cols)

    alias_kwargs = {"input_output_aliases": {0: 0}} if donate else {}
    out2 = pl.pallas_call(
        _passthrough_kernel,
        out_shape=jax.ShapeDtypeStruct((rows, cols), x.dtype),
        grid=(rows // block_rows,),
        in_specs=[pl.BlockSpec((block_rows, cols), lambda i: (i, 0))],
        out_specs=pl.BlockSpec((block_rows, cols), lambda i: (i, 0)),
        compiler_params=pltpu.CompilerParams(
            dimension_semantics=("parallel",),   # shards across v7x's 2 TCs
            vmem_limit_bytes=_VMEM_LIMIT_BYTES,  # legal on v5e's 16 MiB default
        ),
        **alias_kwargs,
    )(x2)

    out_flat = out2.reshape(-1)
    if pad:
        out_flat = out_flat[:total]
    return out_flat.reshape(x.shape)


class GenericModuleJAX:
    """JAX/Pallas mirror of fcore.model.GenericModule (no parameters)."""

    def __init__(self, cfg=None, use_pallas_scaffold: bool = False):
        self.cfg = cfg
        self.training = True                 # mirrors nn.Module default mode
        self.use_pallas_scaffold = use_pallas_scaffold

    # --- dispatch (glue, mirrors PyTorch forward) ---------------------------
    def __call__(self, *args, **kwargs):
        if self.training:
            return self.forward_train(*args, **kwargs)
        return self.forward_eval(*args, **kwargs)

    def forward_train(self, *args, **kwargs):
        return self.forward_generic(*args, **kwargs)

    def forward_eval(self, *args, **kwargs):
        return self.forward_generic(*args, **kwargs)

    # --- "compute" -----------------------------------------------------------
    def forward_generic(self, x):
        # Abstract in the reference; the dispatcher has no compute, so the
        # fastest correct implementation is zero-copy: return the input.
        # TODO(synk): real subclass compute would replace the scaffold below.
        if self.use_pallas_scaffold:
            return _pallas_passthrough(x)
        return x

    def get_losses(self, *args, **kwargs):
        raise NotImplementedError

    def freeze(self, if_freeze=True):
        # No parameters to freeze; kept for interface parity.
        return None

    def train(self):
        self.training = True
        return self

    def eval(self):
        self.training = False
        return self


if __name__ == "__main__":
    key = jax.random.PRNGKey(0)
    k0, k1, k2, k3 = jax.random.split(key, 4)

    # Small NCHW input consistent with a generic vision-model base class.
    x = jax.random.normal(k0, (2, 4, 16, 16), dtype=jnp.float32)

    module = GenericModuleJAX(cfg=None)

    # Dispatcher hot paths (train + eval): zero-copy, no kernel launched.
    y_train = jax.block_until_ready(module(x))
    y_eval = jax.block_until_ready(module.eval()(x))
    assert y_train.shape == x.shape and y_train.dtype == x.dtype
    assert y_eval.shape == x.shape and y_eval.dtype == x.dtype
    assert bool(jnp.array_equal(y_train, x))
    assert bool(jnp.array_equal(y_eval, x))

    # Exercise the Pallas scaffold once on each code path:
    # (a) exact lane-dense layout: (2,4,16,16) f32 -> (1, 2048) slab.
    y_a = jax.block_until_ready(_pallas_passthrough(x))
    assert y_a.shape == x.shape and y_a.dtype == x.dtype
    assert bool(jnp.array_equal(y_a, x))

    # (b) dtype-aware sublanes: bf16 -> 16-row native packing tiles.
    xb = jax.random.normal(k1, (4, 8, 16, 16), dtype=jnp.float32).astype(jnp.bfloat16)
    y_b = jax.block_until_ready(_pallas_passthrough(xb))
    assert y_b.shape == xb.shape and y_b.dtype == xb.dtype
    assert bool(jnp.array_equal(y_b, xb))

    # (c) padding path: prime-ish size with no multiple-of-128 factorization.
    xo = jax.random.normal(k2, (3, 5, 7), dtype=jnp.float32)
    y_c = jax.block_until_ready(_pallas_passthrough(xo))
    assert y_c.shape == xo.shape and y_c.dtype == xo.dtype
    assert bool(jnp.array_equal(y_c, xo))

    # (d) multi-block grid (>= 2 steps -> both v7x TCs participate): 512 KiB.
    xs = jax.random.normal(k3, (128, 1024), dtype=jnp.float32)
    y_d = jax.block_until_ready(_pallas_passthrough(xs))
    assert y_d.shape == xs.shape and y_d.dtype == xs.dtype
    assert bool(jnp.array_equal(y_d, xs))

    # Module with the scaffold explicitly enabled (future real compute site).
    module_scaffold = GenericModuleJAX(cfg=None, use_pallas_scaffold=True)
    y_s = jax.block_until_ready(module_scaffold(x))
    assert bool(jnp.array_equal(y_s, x))

    print("KERNEL_OK")
</pallas_src>

<mosaic_0001>
module attributes {stable_mosaic.version = 11 : i64} {
  func.func @_passthrough_kernel(%arg0: i32, %arg1: memref<1x2048xf32, #tpu.memory_space<vmem>>, %arg2: memref<1x2048xf32, #tpu.memory_space<vmem>>) attributes {dimension_semantics = [#tpu.dimension_semantics<parallel>], iteration_bounds = array<i64: 1>, scalar_prefetch = 0 : i64, scratch_operands = 0 : i64, tpu.core_type = #tpu.core_type<tc>, window_params = [{transform_indices = @transform_0, window_bounds = array<i64: 1, 2048>}, {transform_indices = @transform_1, window_bounds = array<i64: 1, 2048>}]} {
    %c0 = arith.constant 0 : index
    %c0_0 = arith.constant 0 : index
    %0 = vector.load %arg1[%c0, %c0_0] : memref<1x2048xf32, #tpu.memory_space<vmem>>, vector<1x2048xf32>
    %c0_1 = arith.constant 0 : index
    %c0_2 = arith.constant 0 : index
    %1 = vector.load %arg2[%c0_1, %c0_2] : memref<1x2048xf32, #tpu.memory_space<vmem>>, vector<1x2048xf32>
    tpu.vector_store %arg2[%c0_1, %c0_2], %0 {strides = array<i32>} : memref<1x2048xf32, #tpu.memory_space<vmem>>, vector<1x2048xf32>,
    return
  }
  func.func @transform_0(%arg0: i32) -> (i32, i32) {
    %c0_i32 = arith.constant 0 : i32
    %c0_i32_0 = arith.constant 0 : i32
    return %arg0, %c0_i32 : i32, i32
  }
  func.func @transform_1(%arg0: i32) -> (i32, i32) {
    %c0_i32 = arith.constant 0 : i32
    %c0_i32_0 = arith.constant 0 : i32
    return %arg0, %c0_i32 : i32, i32
  }
}

</mosaic_0001>

<bundles_post_ra>
// kernel: tpu_custom_call.1
= control target key start
LH: loop header
LB: loop body
LE: loop exit
PB: predicated region body
PF: predicated region fallthrough
CT: control target
= control target key end

     0   :  { %6 = vsyncpa [#allocation3], 0  ;;  %s116_s0 = inlined_call_operand.hbm [shape: f32[1,2048], index: 0, kind: input, shape index: {}]   ;;  %s117_s1 = inlined_call_operand.hbm [shape: f32[1,2048], index: 1, kind: output, shape index: {}]  }
   0x1   :  { %7 = vsyncpa [#allocation4], 0  ;;  %s13_s8 = sshll.u32 %s116_s0, 4  ;;  %s98_s9 = smov [#allocation2]   ;;  %s14_s8 = int_to_ptr.hbm [resolvable:$true] %s13_s8 }
   0x2   :  { %s15_s10 = sshll.u32 %s98_s9, 4  ;;  %s16_s10 = int_to_ptr.vmem [resolvable:$true] %s15_s10 }
   0x3   :  { %18 = dma.hbm_to_vmem [thread:$0]  %s14_s8, 256, %s16_s10, [#allocation3]  }
   0x4   :  { %94 = dma.done.wait [#allocation3], 256  }
   0x5   :  { %95 = vsyncadd [#allocation3], 4294967040  ;;  %s99_s11 = smov [#allocation5]   ;;  %s34_s15 = sshll.u32 %s117_s1, 4  ;;  %v23_v0 = vld [vmem:[#allocation2] sm:$0xff]  ;;  %v24_v1 = vld [vmem:[#allocation2 + $0x8] sm:$0xff]  ;;  %s35_s15 = int_to_ptr.hbm [resolvable:$true] %s34_s15 }
   0x6   :  { %s32_s12 = sshll.u32 %s99_s11, 4  ;;  %25 = vst [vmem:[#allocation5] sm:$0xff] %v23_v0  ;;  %s33_s12 = int_to_ptr.vmem [resolvable:$true] %s32_s12 }
   0x7   :  { %26 = vst [vmem:[#allocation5 + $0x8] sm:$0xff] %v24_v1 }
   0x8   :  { %37 = dma.vmem_to_hbm [thread:$0]  %s33_s12, 256, %s35_s15, [#allocation4]  }
   0x9   :  { %96 = dma.done.wait [#allocation4], 256  }
   0xa   :  { %97 = vsyncadd [#allocation4], 4294967040 }
   0xb   :  { %42 = vsyncpa [#allocation3], 1 }
   0xc   :  { %43 = vsyncpa [#allocation4], 1 }

</bundles_post_ra>
